<compile_context>
chip_gen: v7x
topology: tpu7x:2x2x1
jax: 0.10.0
libtpu: 0.0.40
codegen_flags: <defaults>
</compile_context>

<pallas_src>
import jax
import jax.numpy as jnp
from jax.experimental import pallas as pl
from jax.experimental.pallas import tpu as pltpu

_BN_EPS = 1e-5
_MIN_PHYS_VMEM = 64 << 20  # v7x per-TC VMEM; smallest across v5e/v6e/v7x generations.


# --------------------------------------------------------------------------- kernel
def _bn_relu(h, gamma, beta):
    """Training-mode BatchNorm1d (biased, *centered* variance) + ReLU. h is f32 (B, T)."""
    inv_b = 1.0 / h.shape[0]
    mean = jnp.sum(h, axis=0, keepdims=True) * inv_b
    c = h - mean
    var = jnp.sum(c * c, axis=0, keepdims=True) * inv_b   # centered -> no cancellation
    scale = gamma * jax.lax.rsqrt(var + _BN_EPS)
    return jnp.maximum(c * scale + beta, 0.0)


def _make_kernel(n_hid_tiles):
    if n_hid_tiles == 1:
        # Single HID tile: skip the accumulator round-trip, write the output directly.
        def kernel(x_ref, w1_ref, g_ref, b_ref, w2_ref, b2_ref, o_ref):
            h = jnp.dot(x_ref[...], w1_ref[...], preferred_element_type=jnp.float32)
            h = _bn_relu(h, g_ref[...], b_ref[...])
            out = jnp.dot(h.astype(w2_ref.dtype), w2_ref[...],
                          preferred_element_type=jnp.float32)
            o_ref[...] = (out + b2_ref[...]).astype(o_ref.dtype)
        return kernel

    def kernel(x_ref, w1_ref, g_ref, b_ref, w2_ref, b2_ref, o_ref, acc_ref):
        # Grid: axis 0 = OUT tile ("parallel"), axis 1 = HID tile (reduction, "arbitrary").
        k = pl.program_id(1)

        @pl.when(k == 0)
        def _():
            acc_ref[...] = jnp.zeros_like(acc_ref)

        # Block 1: Linear (no bias) for this HID tile; operands stay in their native
        # (bf16 by default) dtype, accumulation in f32.
        h = jnp.dot(x_ref[...], w1_ref[...], preferred_element_type=jnp.float32)
        # BatchNorm1d (train-mode, full batch) + ReLU.
        h = _bn_relu(h, g_ref[...], b_ref[...])
        # Block 2: Linear (with bias), accumulated over HID tiles in f32.
        acc_ref[...] += jnp.dot(h.astype(w2_ref.dtype), w2_ref[...],
                                preferred_element_type=jnp.float32)

        @pl.when(k == n_hid_tiles - 1)
        def _():
            o_ref[...] = (acc_ref[...] + b2_ref[...]).astype(o_ref.dtype)

    return kernel


# ------------------------------------------------------------------ tiling / budgets
def _round_up(n, m):
    return -(-n // m) * m


def _vmem_estimate(B, in_dim, hid_tile, out_tile, mm_bytes, out_bytes):
    x_buf   = B * in_dim * mm_bytes              # Buffered(1): single resident copy
    w1_buf  = 2 * in_dim * hid_tile * mm_bytes   # double-buffered weight stream
    gb_buf  = 2 * 2 * hid_tile * 4               # gamma + beta tiles
    w2_buf  = 2 * hid_tile * out_tile * mm_bytes
    b2_buf  = 2 * out_tile * 4
    o_buf   = 2 * B * out_tile * out_bytes
    acc_buf = B * out_tile * 4
    bn_tmp  = 3 * B * hid_tile * 4               # h / centered / squared epilogue temps
    return x_buf + w1_buf + gb_buf + w2_buf + b2_buf + o_buf + acc_buf + bn_tmp


def _divisor_tiles(dim, cap):
    """128-multiples that divide `dim`, descending, capped at `cap`."""
    return sorted((t for t in range(128, min(dim, cap) + 1, 128) if dim % t == 0),
                  reverse=True)


def _derive_tiles(B, in_dim, hid_pad, out_pad, mm_bytes, out_bytes,
                  hid_tile, out_tile, budget):
    def fits(ht, ot):
        return _vmem_estimate(B, in_dim, ht, ot, mm_bytes, out_bytes) <= budget

    # One OUT tile whenever possible: splitting OUT duplicates x@w1 and the BN pass.
    if out_tile is None or out_pad % out_tile or out_tile % 128:
        out_tile = out_pad
    if hid_tile is None or hid_pad % hid_tile or hid_tile % 128:
        hid_tile = None
        for ht in _divisor_tiles(hid_pad, 512):
            if fits(ht, out_tile):
                hid_tile = ht
                break
        if hid_tile is None:
            hid_tile = 128
    if not fits(hid_tile, out_tile) and out_tile == out_pad:
        for ot in _divisor_tiles(out_pad, 512):
            if fits(hid_tile, ot):
                out_tile = ot
                break
    est = _vmem_estimate(B, in_dim, hid_tile, out_tile, mm_bytes, out_bytes)
    return hid_tile, out_tile, est


# ----------------------------------------------------------------------- entry point
def projection_head_forward(x, w1_t, gamma, beta, w2_t, b2, *,
                            hid_tile=None, out_tile=None,
                            use_bf16_matmul=True,
                            vmem_budget_bytes=40 << 20,
                            weight_buffers=2):
    """x: (B, IN). w1_t: (IN, HID). gamma/beta: (1, HID). w2_t: (HID, OUT). b2: (1, OUT).

    Weights are pre-transposed to (in_features, out_features). Matmuls run in bf16 by
    default (f32 accumulation / BN statistics); pass use_bf16_matmul=False for an
    exact-f32 path. NOTE: the padding / dtype casts below constant-fold under jit; for
    a hot loop with fixed weights, hoist them out of the per-step call.
    """
    B, in_dim = x.shape
    hid_dim = w1_t.shape[1]
    out_dim = w2_t.shape[1]
    out_dtype = x.dtype

    # MXU fast path: bf16 operands, f32 accumulation.
    mm_dtype = jnp.bfloat16 if (use_bf16_matmul and x.dtype == jnp.float32) else x.dtype

    # Lane-dense padding: HID and OUT padded to multiples of 128.  Exact: padded HID
    # features come from zero w1 columns and feed zero w2 rows; padded OUT columns are
    # sliced off below.
    hid_pad = _round_up(hid_dim, 128)
    out_pad = max(128, _round_up(out_dim, 128))
    if hid_pad != hid_dim:
        dh = hid_pad - hid_dim
        w1_t = jnp.pad(w1_t, ((0, 0), (0, dh)))
        gamma = jnp.pad(gamma, ((0, 0), (0, dh)), constant_values=1.0)
        beta = jnp.pad(beta, ((0, 0), (0, dh)))
        w2_t = jnp.pad(w2_t, ((0, dh), (0, 0)))
    if out_pad != out_dim:
        do = out_pad - out_dim
        w2_t = jnp.pad(w2_t, ((0, 0), (0, do)))
        b2 = jnp.pad(b2, ((0, 0), (0, do)))

    x_mm = x.astype(mm_dtype)
    w1_t = w1_t.astype(mm_dtype)
    w2_t = w2_t.astype(mm_dtype)
    gamma = gamma.astype(jnp.float32)
    beta = beta.astype(jnp.float32)
    b2 = b2.astype(jnp.float32)

    mm_bytes = jnp.dtype(mm_dtype).itemsize
    out_bytes = jnp.dtype(out_dtype).itemsize
    budget = min(vmem_budget_bytes, _MIN_PHYS_VMEM - (16 << 20))
    hid_tile, out_tile, est = _derive_tiles(B, in_dim, hid_pad, out_pad,
                                            mm_bytes, out_bytes,
                                            hid_tile, out_tile, budget)
    n_hid_tiles = hid_pad // hid_tile
    n_out_tiles = out_pad // out_tile
    grid = (n_out_tiles, n_hid_tiles)

    # Explicit scoped-VMEM limit derived from the tile budget (defaults: 16 MiB v5e /
    # 32 MiB v6e,v7x), clamped below the smallest physical VMEM (v7x: 64 MiB per TC).
    vmem_limit = int(min(max(est * 1.25 + (4 << 20), 32 << 20),
                         _MIN_PHYS_VMEM - (8 << 20)))

    weight_mode = None if weight_buffers == 2 else pl.Buffered(weight_buffers)

    def _wspec(shape, index_map):
        if weight_mode is None:
            return pl.BlockSpec(shape, index_map)
        return pl.BlockSpec(shape, index_map, pipeline_mode=weight_mode)

    scratch_shapes = ([] if n_hid_tiles == 1
                      else [pltpu.VMEM((B, out_tile), jnp.float32)])

    def _build_and_run(single_buffer_x):
        # x is batch-resident with a constant index_map: the pipeliner already elides
        # re-copies, so a single buffer saves B*IN bytes of VMEM at zero DMA cost.
        if single_buffer_x:
            x_spec = pl.BlockSpec((B, in_dim), lambda j, k: (0, 0),
                                  pipeline_mode=pl.Buffered(1))
        else:
            x_spec = pl.BlockSpec((B, in_dim), lambda j, k: (0, 0))
        in_specs = [
            x_spec,
            _wspec((in_dim, hid_tile), lambda j, k: (0, k)),   # w1 column tile
            pl.BlockSpec((1, hid_tile), lambda j, k: (0, k)),  # gamma tile
            pl.BlockSpec((1, hid_tile), lambda j, k: (0, k)),  # beta tile
            _wspec((hid_tile, out_tile), lambda j, k: (k, j)), # w2 row tile
            pl.BlockSpec((1, out_tile), lambda j, k: (0, j)),  # bias tile
        ]
        return pl.pallas_call(
            _make_kernel(n_hid_tiles),
            out_shape=jax.ShapeDtypeStruct((B, out_pad), out_dtype),
            grid_spec=pltpu.PrefetchScalarGridSpec(
                num_scalar_prefetch=0,
                grid=grid,
                in_specs=in_specs,
                out_specs=pl.BlockSpec((B, out_tile), lambda j, k: (0, j)),
                scratch_shapes=scratch_shapes,
            ),
            compiler_params=pltpu.CompilerParams(
                dimension_semantics=("parallel", "arbitrary"),
                vmem_limit_bytes=vmem_limit,
            ),
        )(x_mm, w1_t, gamma, beta, w2_t, b2)

    try:
        out = _build_and_run(True)
    except Exception:
        # Fallback for toolchains that reject a single-buffer pipeline_mode; only costs
        # the extra x buffer in VMEM.
        out = _build_and_run(False)

    return out[:, :out_dim] if out_pad != out_dim else out


# ---------------------------------------------------------------------------- testing
def _reference_forward(x, w1_t, gamma, beta, w2_t, b2, mm_dtype=jnp.float32):
    h = jnp.dot(x.astype(mm_dtype), w1_t.astype(mm_dtype),
                preferred_element_type=jnp.float32)
    mean = h.mean(axis=0, keepdims=True)
    var = ((h - mean) ** 2).mean(axis=0, keepdims=True)
    h = (h - mean) * jax.lax.rsqrt(var + _BN_EPS) * gamma + beta
    h = jnp.maximum(h, 0.0)
    out = jnp.dot(h.astype(mm_dtype), w2_t.astype(mm_dtype),
                  preferred_element_type=jnp.float32) + b2
    return out.astype(x.dtype)


def _make_params(key, in_dim, hid_dim, out_dim):
    k1, k2, kb = jax.random.split(key, 3)
    lim1 = 1.0 / (in_dim ** 0.5)
    w1_t = jax.random.uniform(k1, (in_dim, hid_dim), jnp.float32, -lim1, lim1)
    gamma = jnp.ones((1, hid_dim), jnp.float32)
    beta = jnp.zeros((1, hid_dim), jnp.float32)
    lim2 = 1.0 / (hid_dim ** 0.5)
    w2_t = jax.random.uniform(k2, (hid_dim, out_dim), jnp.float32, -lim2, lim2)
    b2 = jax.random.uniform(kb, (1, out_dim), jnp.float32, -lim2, lim2)
    return w1_t, gamma, beta, w2_t, b2


if __name__ == "__main__":
    key = jax.random.PRNGKey(0)

    # --- Case 1: spec-like small shapes; exercises HID/OUT padding + single-tile path.
    B, IN_DIM, HID_DIM, OUT_DIM = 8, 32, 64, 16
    kx, kp, kx2, kp2 = jax.random.split(key, 4)
    x = jax.random.normal(kx, (B, IN_DIM), dtype=jnp.float32)
    params = _make_params(kp, IN_DIM, HID_DIM, OUT_DIM)

    # Exact-f32 path -> tight check against the f32 reference.
    out_f32 = jax.block_until_ready(
        projection_head_forward(x, *params, use_bf16_matmul=False))
    ref_f32 = _reference_forward(x, *params)
    assert out_f32.shape == (B, OUT_DIM)
    assert jnp.allclose(out_f32, ref_f32, atol=1e-4, rtol=1e-4)

    # Default bf16-MXU path -> compare against a bf16-matmul reference.
    out_bf = jax.block_until_ready(projection_head_forward(x, *params))
    ref_bf = _reference_forward(x, *params, mm_dtype=jnp.bfloat16)
    assert jnp.allclose(out_bf, ref_bf, atol=1e-2, rtol=1e-2)

    # --- Case 2: exercises the HID-tiled accumulation path (grid = (1, 2)).
    B2, IN2, HID2, OUT2 = 16, 128, 256, 32
    x2 = jax.random.normal(kx2, (B2, IN2), dtype=jnp.float32)
    params2 = _make_params(kp2, IN2, HID2, OUT2)

    out2_f32 = jax.block_until_ready(
        projection_head_forward(x2, *params2, hid_tile=128, use_bf16_matmul=False))
    ref2_f32 = _reference_forward(x2, *params2)
    assert out2_f32.shape == (B2, OUT2)
    assert jnp.allclose(out2_f32, ref2_f32, atol=1e-4, rtol=1e-4)

    out2_bf = jax.block_until_ready(
        projection_head_forward(x2, *params2, hid_tile=128))
    ref2_bf = _reference_forward(x2, *params2, mm_dtype=jnp.bfloat16)
    assert jnp.allclose(out2_bf, ref2_bf, atol=1e-2, rtol=1e-2)

    print("KERNEL_OK")
</pallas_src>

<mosaic_0001>
module attributes {stable_mosaic.version = 11 : i64} {
  func.func @kernel(%arg0: i32, %arg1: i32, %arg2: memref<8x32xf32, #tpu.memory_space<vmem>>, %arg3: memref<32x128xf32, #tpu.memory_space<vmem>>, %arg4: memref<1x128xf32, #tpu.memory_space<vmem>>, %arg5: memref<1x128xf32, #tpu.memory_space<vmem>>, %arg6: memref<128x128xf32, #tpu.memory_space<vmem>>, %arg7: memref<1x128xf32, #tpu.memory_space<vmem>>, %arg8: memref<8x128xf32, #tpu.memory_space<vmem>>) attributes {dimension_semantics = [#tpu.dimension_semantics<parallel>, #tpu.dimension_semantics<arbitrary>], iteration_bounds = array<i64: 1, 1>, scalar_prefetch = 0 : i64, scratch_operands = 0 : i64, tpu.core_type = #tpu.core_type<tc>, window_params = [{pipeline_mode = #tpu.pipeline_mode<synchronous>, transform_indices = @transform_0, window_bounds = array<i64: 8, 32>}, {transform_indices = @transform_1, window_bounds = array<i64: 32, 128>}, {transform_indices = @transform_2, window_bounds = array<i64: 1, 128>}, {transform_indices = @transform_3, window_bounds = array<i64: 1, 128>}, {transform_indices = @transform_4, window_bounds = array<i64: 128, 128>}, {transform_indices = @transform_5, window_bounds = array<i64: 1, 128>}, {transform_indices = @transform_6, window_bounds = array<i64: 8, 128>}]} {
    %c0 = arith.constant 0 : index
    %c0_0 = arith.constant 0 : index
    %0 = vector.load %arg2[%c0, %c0_0] : memref<8x32xf32, #tpu.memory_space<vmem>>, vector<8x32xf32>
    %c0_1 = arith.constant 0 : index
    %c0_2 = arith.constant 0 : index
    %1 = vector.load %arg3[%c0_1, %c0_2] : memref<32x128xf32, #tpu.memory_space<vmem>>, vector<32x128xf32>
    %cst = arith.constant dense<0.000000e+00> : vector<8x128xf32>
    %2 = tpu.matmul %0, %1, %cst {dimension_numbers = #tpu.dot_dimension_numbers<[1], [0], [0], [1], [0, 0, 1, 1], [], []>} : vector<8x32xf32>, vector<32x128xf32>, vector<8x128xf32> -> vector<8x128xf32>
    %c0_3 = arith.constant 0 : index
    %c0_4 = arith.constant 0 : index
    %3 = vector.load %arg4[%c0_3, %c0_4] : memref<1x128xf32, #tpu.memory_space<vmem>>, vector<1x128xf32>
    %c0_5 = arith.constant 0 : index
    %c0_6 = arith.constant 0 : index
    %4 = vector.load %arg5[%c0_5, %c0_6] : memref<1x128xf32, #tpu.memory_space<vmem>>, vector<1x128xf32>
    %cst_7 = arith.constant dense<0.000000e+00> : vector<128xf32>
    %5 = vector.multi_reduction <add>, %2, %cst_7 [0] : vector<8x128xf32> to vector<128xf32>
    %6 = vector.shape_cast %5 : vector<128xf32> to vector<1x128xf32>
    %cst_8 = arith.constant 1.250000e-01 : f32
    %7 = vector.broadcast %cst_8 : f32 to vector<1x128xf32>
    %8 = arith.mulf %6, %7 : vector<1x128xf32>
    %9 = vector.broadcast %8 : vector<1x128xf32> to vector<8x128xf32>
    %10 = arith.subf %2, %9 : vector<8x128xf32>
    %11 = arith.mulf %10, %10 : vector<8x128xf32>
    %cst_9 = arith.constant dense<0.000000e+00> : vector<128xf32>
    %12 = vector.multi_reduction <add>, %11, %cst_9 [0] : vector<8x128xf32> to vector<128xf32>
    %13 = vector.shape_cast %12 : vector<128xf32> to vector<1x128xf32>
    %cst_10 = arith.constant 1.250000e-01 : f32
    %14 = vector.broadcast %cst_10 : f32 to vector<1x128xf32>
    %15 = arith.mulf %13, %14 : vector<1x128xf32>
    %cst_11 = arith.constant 9.99999974E-6 : f32
    %16 = vector.broadcast %cst_11 : f32 to vector<1x128xf32>
    %17 = arith.addf %15, %16 : vector<1x128xf32>
    %18 = math.rsqrt %17 : vector<1x128xf32>
    %19 = arith.mulf %3, %18 : vector<1x128xf32>
    %20 = vector.broadcast %19 : vector<1x128xf32> to vector<8x128xf32>
    %21 = arith.mulf %10, %20 : vector<8x128xf32>
    %22 = vector.broadcast %4 : vector<1x128xf32> to vector<8x128xf32>
    %23 = arith.addf %21, %22 : vector<8x128xf32>
    %cst_12 = arith.constant 0.000000e+00 : f32
    %24 = vector.broadcast %cst_12 : f32 to vector<8x128xf32>
    %25 = arith.maximumf %23, %24 : vector<8x128xf32>
    %c0_13 = arith.constant 0 : index
    %c0_14 = arith.constant 0 : index
    %26 = vector.load %arg6[%c0_13, %c0_14] : memref<128x128xf32, #tpu.memory_space<vmem>>, vector<128x128xf32>
    %cst_15 = arith.constant dense<0.000000e+00> : vector<8x128xf32>
    %27 = tpu.matmul %25, %26, %cst_15 {dimension_numbers = #tpu.dot_dimension_numbers<[1], [0], [0], [1], [0, 0, 1, 1], [], []>} : vector<8x128xf32>, vector<128x128xf32>, vector<8x128xf32> -> vector<8x128xf32>
    %c0_16 = arith.constant 0 : index
    %c0_17 = arith.constant 0 : index
    %28 = vector.load %arg7[%c0_16, %c0_17] : memref<1x128xf32, #tpu.memory_space<vmem>>, vector<1x128xf32>
    %29 = vector.broadcast %28 : vector<1x128xf32> to vector<8x128xf32>
    %30 = arith.addf %27, %29 : vector<8x128xf32>
    %c0_18 = arith.constant 0 : index
    %c0_19 = arith.constant 0 : index
    %31 = vector.load %arg8[%c0_18, %c0_19] : memref<8x128xf32, #tpu.memory_space<vmem>>, vector<8x128xf32>
    tpu.vector_store %arg8[%c0_18, %c0_19], %30 {strides = array<i32>} : memref<8x128xf32, #tpu.memory_space<vmem>>, vector<8x128xf32>,
    return
  }
  func.func @transform_0(%arg0: i32, %arg1: i32) -> (i32, i32) {
    %c0_i32 = arith.constant 0 : i32
    %c0_i32_0 = arith.constant 0 : i32
    %c0_i32_1 = arith.constant 0 : i32
    return %c0_i32, %c0_i32_0 : i32, i32
  }
  func.func @transform_1(%arg0: i32, %arg1: i32) -> (i32, i32) {
    %c0_i32 = arith.constant 0 : i32
    %c0_i32_0 = arith.constant 0 : i32
    return %c0_i32, %arg1 : i32, i32
  }
  func.func @transform_2(%arg0: i32, %arg1: i32) -> (i32, i32) {
    %c0_i32 = arith.constant 0 : i32
    %c0_i32_0 = arith.constant 0 : i32
    return %c0_i32, %arg1 : i32, i32
  }
  func.func @transform_3(%arg0: i32, %arg1: i32) -> (i32, i32) {
    %c0_i32 = arith.constant 0 : i32
    %c0_i32_0 = arith.constant 0 : i32
    return %c0_i32, %arg1 : i32, i32
  }
  func.func @transform_4(%arg0: i32, %arg1: i32) -> (i32, i32) {
    %c0_i32 = arith.constant 0 : i32
    return %arg1, %arg0 : i32, i32
  }
  func.func @transform_5(%arg0: i32, %arg1: i32) -> (i32, i32) {
    %c0_i32 = arith.constant 0 : i32
    %c0_i32_0 = arith.constant 0 : i32
    return %c0_i32, %arg0 : i32, i32
  }
  func.func @transform_6(%arg0: i32, %arg1: i32) -> (i32, i32) {
    %c0_i32 = arith.constant 0 : i32
    %c0_i32_0 = arith.constant 0 : i32
    return %c0_i32, %arg0 : i32, i32
  }
}

module attributes {stable_mosaic.version = 11 : i64} {
  func.func @kernel(%arg0: i32, %arg1: i32, %arg2: memref<8x32xf32, #tpu.memory_space<vmem>>, %arg3: memref<32x128xf32, #tpu.memory_space<vmem>>, %arg4: memref<1x128xf32, #tpu.memory_space<vmem>>, %arg5: memref<1x128xf32, #tpu.memory_space<vmem>>, %arg6: memref<128x128xf32, #tpu.memory_space<vmem>>, %arg7: memref<1x128xf32, #tpu.memory_space<vmem>>, %arg8: memref<8x128xf32, #tpu.memory_space<vmem>>) attributes {dimension_semantics = [#tpu.dimension_semantics<parallel>, #tpu.dimension_semantics<arbitrary>], iteration_bounds = array<i64: 1, 1>, scalar_prefetch = 0 : i64, scratch_operands = 0 : i64, tpu.core_type = #tpu.core_type<tc>, window_params = [{pipeline_mode = #tpu.pipeline_mode<synchronous>, transform_indices = @transform_0, window_bounds = array<i64: 8, 32>}, {transform_indices = @transform_1, window_bounds = array<i64: 32, 128>}, {transform_indices = @transform_2, window_bounds = array<i64: 1, 128>}, {transform_indices = @transform_3, window_bounds = array<i64: 1, 128>}, {transform_indices = @transform_4, window_bounds = array<i64: 128, 128>}, {transform_indices = @transform_5, window_bounds = array<i64: 1, 128>}, {transform_indices = @transform_6, window_bounds = array<i64: 8, 128>}]} {
    %c0 = arith.constant 0 : index
    %c0_0 = arith.constant 0 : index
    %0 = vector.load %arg2[%c0, %c0_0] : memref<8x32xf32, #tpu.memory_space<vmem>>, vector<8x32xf32>
    %c0_1 = arith.constant 0 : index
    %c0_2 = arith.constant 0 : index
    %1 = vector.load %arg3[%c0_1, %c0_2] : memref<32x128xf32, #tpu.memory_space<vmem>>, vector<32x128xf32>
    %cst = arith.constant dense<0.000000e+00> : vector<8x128xf32>
    %2 = tpu.matmul %0, %1, %cst {dimension_numbers = #tpu.dot_dimension_numbers<[1], [0], [0], [1], [0, 0, 1, 1], [], []>} : vector<8x32xf32>, vector<32x128xf32>, vector<8x128xf32> -> vector<8x128xf32>
    %c0_3 = arith.constant 0 : index
    %c0_4 = arith.constant 0 : index
    %3 = vector.load %arg4[%c0_3, %c0_4] : memref<1x128xf32, #tpu.memory_space<vmem>>, vector<1x128xf32>
    %c0_5 = arith.constant 0 : index
    %c0_6 = arith.constant 0 : index
    %4 = vector.load %arg5[%c0_5, %c0_6] : memref<1x128xf32, #tpu.memory_space<vmem>>, vector<1x128xf32>
    %cst_7 = arith.constant dense<0.000000e+00> : vector<128xf32>
    %5 = vector.multi_reduction <add>, %2, %cst_7 [0] : vector<8x128xf32> to vector<128xf32>
    %6 = vector.shape_cast %5 : vector<128xf32> to vector<1x128xf32>
    %cst_8 = arith.constant 1.250000e-01 : f32
    %7 = vector.broadcast %cst_8 : f32 to vector<1x128xf32>
    %8 = arith.mulf %6, %7 : vector<1x128xf32>
    %9 = vector.broadcast %8 : vector<1x128xf32> to vector<8x128xf32>
    %10 = arith.subf %2, %9 : vector<8x128xf32>
    %11 = arith.mulf %10, %10 : vector<8x128xf32>
    %cst_9 = arith.constant dense<0.000000e+00> : vector<128xf32>
    %12 = vector.multi_reduction <add>, %11, %cst_9 [0] : vector<8x128xf32> to vector<128xf32>
    %13 = vector.shape_cast %12 : vector<128xf32> to vector<1x128xf32>
    %cst_10 = arith.constant 1.250000e-01 : f32
    %14 = vector.broadcast %cst_10 : f32 to vector<1x128xf32>
    %15 = arith.mulf %13, %14 : vector<1x128xf32>
    %cst_11 = arith.constant 9.99999974E-6 : f32
    %16 = vector.broadcast %cst_11 : f32 to vector<1x128xf32>
    %17 = arith.addf %15, %16 : vector<1x128xf32>
    %18 = math.rsqrt %17 : vector<1x128xf32>
    %19 = arith.mulf %3, %18 : vector<1x128xf32>
    %20 = vector.broadcast %19 : vector<1x128xf32> to vector<8x128xf32>
    %21 = arith.mulf %10, %20 : vector<8x128xf32>
    %22 = vector.broadcast %4 : vector<1x128xf32> to vector<8x128xf32>
    %23 = arith.addf %21, %22 : vector<8x128xf32>
    %cst_12 = arith.constant 0.000000e+00 : f32
    %24 = vector.broadcast %cst_12 : f32 to vector<8x128xf32>
    %25 = arith.maximumf %23, %24 : vector<8x128xf32>
    %c0_13 = arith.constant 0 : index
    %c0_14 = arith.constant 0 : index
    %26 = vector.load %arg6[%c0_13, %c0_14] : memref<128x128xf32, #tpu.memory_space<vmem>>, vector<128x128xf32>
    %cst_15 = arith.constant dense<0.000000e+00> : vector<8x128xf32>
    %27 = tpu.matmul %25, %26, %cst_15 {dimension_numbers = #tpu.dot_dimension_numbers<[1], [0], [0], [1], [0, 0, 1, 1], [], []>} : vector<8x128xf32>, vector<128x128xf32>, vector<8x128xf32> -> vector<8x128xf32>
    %c0_16 = arith.constant 0 : index
    %c0_17 = arith.constant 0 : index
    %28 = vector.load %arg7[%c0_16, %c0_17] : memref<1x128xf32, #tpu.memory_space<vmem>>, vector<1x128xf32>
    %29 = vector.broadcast %28 : vector<1x128xf32> to vector<8x128xf32>
    %30 = arith.addf %27, %29 : vector<8x128xf32>
    %c0_18 = arith.constant 0 : index
    %c0_19 = arith.constant 0 : index
    %31 = vector.load %arg8[%c0_18, %c0_19] : memref<8x128xf32, #tpu.memory_space<vmem>>, vector<8x128xf32>
    tpu.vector_store %arg8[%c0_18, %c0_19], %30 {strides = array<i32>} : memref<8x128xf32, #tpu.memory_space<vmem>>, vector<8x128xf32>,
    return
  }
  func.func @transform_0(%arg0: i32, %arg1: i32) -> (i32, i32) {
    %c0_i32 = arith.constant 0 : i32
    %c0_i32_0 = arith.constant 0 : i32
    %c0_i32_1 = arith.constant 0 : i32
    return %c0_i32, %c0_i32_0 : i32, i32
  }
  func.func @transform_1(%arg0: i32, %arg1: i32) -> (i32, i32) {
    %c0_i32 = arith.constant 0 : i32
    %c0_i32_0 = arith.constant 0 : i32
    return %c0_i32, %arg1 : i32, i32
  }
  func.func @transform_2(%arg0: i32, %arg1: i32) -> (i32, i32) {
    %c0_i32 = arith.constant 0 : i32
    %c0_i32_0 = arith.constant 0 : i32
    return %c0_i32, %arg1 : i32, i32
  }
  func.func @transform_3(%arg0: i32, %arg1: i32) -> (i32, i32) {
    %c0_i32 = arith.constant 0 : i32
    %c0_i32_0 = arith.constant 0 : i32
    return %c0_i32, %arg1 : i32, i32
  }
  func.func @transform_4(%arg0: i32, %arg1: i32) -> (i32, i32) {
    %c0_i32 = arith.constant 0 : i32
    return %arg1, %arg0 : i32, i32
  }
  func.func @transform_5(%arg0: i32, %arg1: i32) -> (i32, i32) {
    %c0_i32 = arith.constant 0 : i32
    %c0_i32_0 = arith.constant 0 : i32
    return %c0_i32, %arg0 : i32, i32
  }
  func.func @transform_6(%arg0: i32, %arg1: i32) -> (i32, i32) {
    %c0_i32 = arith.constant 0 : i32
    %c0_i32_0 = arith.constant 0 : i32
    return %c0_i32, %arg0 : i32, i32
  }
}

</mosaic_0001>

<bundles_post_ra>
// kernel: tpu_custom_call.1
= control target key start
LH: loop header
LB: loop body
LE: loop exit
PB: predicated region body
PF: predicated region fallthrough
CT: control target
= control target key end

     0   :  { %11 = vsyncpa [#allocation3], 0  ;;  %s601_s0 = inlined_call_operand.hbm [shape: f32[8,32], index: 0, kind: input, shape index: {}]   ;;  %s602_s1 = inlined_call_operand.hbm [shape: f32[32,128], index: 1, kind: input, shape index: {}]   ;;  %s603_s2 = inlined_call_operand.vmem [shape: f32[1,128], index: 2, kind: input, shape index: {}]   ;;  %s604_s3 = inlined_call_operand.vmem [shape: f32[1,128], index: 3, kind: input, shape index: {}]   ;;  %s605_s4 = inlined_call_operand.hbm [shape: f32[128,128], index: 4, kind: input, shape index: {}]   ;;  %s606_s5 = inlined_call_operand.vmem [shape: f32[1,128], index: 5, kind: input, shape index: {}]   ;;  %s607_s6 = inlined_call_operand.hbm [shape: f32[8,128], index: 6, kind: output, shape index: {}]  }
   0x1   :  { %12 = vsyncpa [#allocation6], 0 }
   0x2   :  { %13 = vsyncpa [#allocation4], 0  ;;  %s494_s21 = smov [#allocation5]   ;;  %s400_s25 = scalar_lea.hbm %s602_s1, 512 }
   0x3   :  { %s29_s22 = sshll.u32 %s494_s21, 4  ;;  %p401_p0 = scmp.ne.s32.totalorder %s602_s1, %s400_s25  ;;  %s30_s22 = int_to_ptr.vmem [resolvable:$true] %s29_s22 }
   0x4   :  { %p404_p1 = scmp.lt.u32.totalorder %s400_s25, %s602_s1 }
   0x6   :  { %p406_p2 = pnand %p404_p1, %p401_p0 }
   0x8   :  { %409 = shalt.err (!%p406_p2)
}
   0x9   :  { %s410_s30 = scalar_lea.vmem %s30_s22, 512  ;;  %p415_p4 = scmp.lt.s32.totalorder %s30_s22, %s30_s22 }
   0xa   :  { %p411_p3 = scmp.ne.s32.totalorder %s30_s22, %s410_s30  ;;  %p416_p5 = scmp.lt.s32.totalorder %s410_s30, %s410_s30 }
   0xc   :  { %p417_p6 = por %p416_p5, %p415_p4 }
   0xe   :  { %p418_p7 = pnand %p417_p6, %p411_p3 }
  0x10   :  { %421 = shalt.err (!%p418_p7)
}
  0x11   :  { %s495_s7 = smov 128   ;;  %s496_s8 = smov 8  }
  0x12   :  { %35 = dma.hbm_to_vmem [thread:$0]  %s602_s1, 512, %s30_s22, [#allocation6], %s495_s7, %s495_s7, %s496_s8  }
  0x13   :  { %s497_s11 = smov [#allocation2]   ;;  %s498_s13 = smov [#allocation7]  }
  0x14   :  { %s20_s12 = sshll.u32 %s497_s11, 4  ;;  %s45_s14 = sshll.u32 %s498_s13, 4  ;;  %s21_s12 = int_to_ptr.vmem [resolvable:$true] %s20_s12  ;;  %s46_s14 = int_to_ptr.vmem [resolvable:$true] %s45_s14 }
  0x15   :  { %s422_s17 = scalar_lea.hbm %s601_s0, 128 }
  0x16   :  { %p423_p8 = scmp.ne.s32.totalorder %s601_s0, %s422_s17  ;;  %p426_p9 = scmp.lt.u32.totalorder %s422_s17, %s601_s0 }
  0x18   :  { %p428_p10 = pnand %p426_p9, %p423_p8 }
  0x1a   :  { %431 = shalt.err (!%p428_p10)
}
  0x1b   :  { %s432_s1 = scalar_lea.vmem %s21_s12, 128  ;;  %p437_p12 = scmp.lt.s32.totalorder %s21_s12, %s21_s12 }
  0x1c   :  { %p433_p11 = scmp.ne.s32.totalorder %s21_s12, %s432_s1  ;;  %p438_p13 = scmp.lt.s32.totalorder %s432_s1, %s432_s1 }
  0x1e   :  { %p439_p0 = por %p438_p13, %p437_p12 }
  0x20   :  { %p440_p1 = pnand %p439_p0, %p433_p11 }
  0x22   :  { %443 = shalt.err (!%p440_p1)
}
  0x23   :  { %23 = dma.hbm_to_vmem [thread:$0]  %s601_s0, 128, %s21_s12, [#allocation3]  }
  0x24   :  { %s444_s26 = scalar_lea.hbm %s605_s4, 2048 }
  0x25   :  { %p445_p2 = scmp.ne.s32.totalorder %s605_s4, %s444_s26  ;;  %p448_p3 = scmp.lt.u32.totalorder %s444_s26, %s605_s4 }
  0x27   :  { %p450_p4 = pnand %p448_p3, %p445_p2 }
  0x29   :  { %453 = shalt.err (!%p450_p4)
}
  0x2a   :  { %s454_s9 = scalar_lea.vmem %s46_s14, 2048  ;;  %p459_p6 = scmp.lt.s32.totalorder %s46_s14, %s46_s14 }
  0x2b   :  { %p455_p5 = scmp.ne.s32.totalorder %s46_s14, %s454_s9  ;;  %p460_p7 = scmp.lt.s32.totalorder %s454_s9, %s454_s9 }
  0x2d   :  { %p461_p8 = por %p460_p7, %p459_p6 }
  0x2f   :  { %p462_p9 = pnand %p461_p8, %p455_p5 }
  0x31   :  { %465 = shalt.err (!%p462_p9)
}
  0x32   :  { %51 = dma.hbm_to_vmem [thread:$0]  %s605_s4, 2048, %s46_s14, [#allocation6], %s495_s7, %s495_s7, %s496_s8  }
  0x33   :  { %488 = dma.done.wait [#allocation3], 128  }
  0x34   :  { %489 = vsyncadd [#allocation3], 4294967168 }
  0x35   :  { %490 = dma.done.wait [#allocation6], 2560  }
  0x36   :  { %491 = vsyncadd [#allocation6], 4294964736  ;;  %v499_v0 = vmov 0.0|0.0   ;;  %vm500_vm0 = vmmov 0   ;;  %v501_v1 = vmov 0.0   ;;  %v64_v2 = vld [vmem:[#allocation5] sm:$0xff]  ;;  %v164_v52 = vlaneseq }
  0x37   :  { %359 = vmatprep.subr.bf16.mxu0 %v499_v0  ;;  %321 = vmatprep.mubr.msk.f32.mxu0 %vm500_vm0, %v501_v1  ;;  %v65_v3 = vld [vmem:[#allocation5 + $0x8] sm:$0xff]  ;;  %v66_v4 = vld [vmem:[#allocation5 + $0x10] sm:$0xff]  ;;  %v67_v6 = vld [vmem:[#allocation5 + $0x18] sm:$0xff]  ;;  %vm68_vm1 = vcmask 261120   ;;  %s502_s14 = smov [#allocation8]  }
  0x38   :  { %365 = vmatprep.subr.bf16.mxu1 %v499_v0  ;;  %356 = vmatprep.mubr.msk.f32.mxu1 %vm500_vm0, %v501_v1  ;;  %v360_v5 = vpack.c.bf16 %v65_v3, %v64_v2  ;;  %v363_v7 = vpack.c.bf16 %v67_v6, %v66_v4  ;;  %v63_v8 = vld [vmem:[#allocation2] sm:$0xff]  ;;  %v178_v9 = vld [vmem:[#allocation7] sm:$0xff]  ;;  %v179_v10 = vld [vmem:[#allocation7 + $0x8] sm:$0xff]  ;;  %v165_v53 = vshrl.u32 %v164_v52, 7  ;;  %s278_s15 = sshll.u32 %s502_s14, 4  ;;  %s279_s15 = int_to_ptr.vmem [resolvable:$true] %s278_s15 }
  0x39   :  { %v366_v11 = vpack.c.bf16 %v179_v10, %v178_v9  ;;  %v180_v12 = vld [vmem:[#allocation7 + $0x10] sm:$0xff]  ;;  %v181_v13 = vld [vmem:[#allocation7 + $0x18] sm:$0xff]  ;;  %v182_v15 = vld [vmem:[#allocation7 + $0x20] sm:$0xff]  ;;  %p471_p11 = scmp.lt.s32.totalorder %s279_s15, %s279_s15 }
  0x3a   :  { %361 = vmatpush3.bf16.msra.mxu0 %v360_v5  ;;  %v369_v14 = vpack.c.bf16 %v181_v13, %v180_v12  ;;  %v183_v16 = vld [vmem:[#allocation7 + $0x28] sm:$0xff]  ;;  %v184_v18 = vld [vmem:[#allocation7 + $0x30] sm:$0xff]  ;;  %v185_v19 = vld [vmem:[#allocation7 + $0x38] sm:$0xff]  ;;  %v166_v55 = vsub.s32 0, %v165_v53 }
  0x3b   :  { %362 = vmatprep.subr.bf16.mxu0 %v499_v0  ;;  %367 = vmatpush3.bf16.msra.mxu1 %v366_v11  ;;  %v372_v17 = vpack.c.bf16 %v183_v16, %v182_v15  ;;  %v375_v20 = vpack.c.bf16 %v185_v19, %v184_v18  ;;  %v186_v21 = vld [vmem:[#allocation7 + $0x40] sm:$0xff]  ;;  %v187_v22 = vld [vmem:[#allocation7 + $0x48] sm:$0xff]  ;;  %v188_v24 = vld [vmem:[#allocation7 + $0x50] sm:$0xff] }
  0x3c   :  { %368 = vmatprep.subr.bf16.mxu1 %v499_v0  ;;  %v378_v23 = vpack.c.bf16 %v187_v22, %v186_v21  ;;  %v189_v25 = vld [vmem:[#allocation7 + $0x58] sm:$0xff]  ;;  %v190_v27 = vld [vmem:[#allocation7 + $0x60] sm:$0xff]  ;;  %v191_v28 = vld [vmem:[#allocation7 + $0x68] sm:$0xff] }
  0x3d   :  { %v381_v26 = vpack.c.bf16 %v189_v25, %v188_v24  ;;  %v384_v29 = vpack.c.bf16 %v191_v28, %v190_v27  ;;  %v192_v30 = vld [vmem:[#allocation7 + $0x70] sm:$0xff]  ;;  %v193_v31 = vld [vmem:[#allocation7 + $0x78] sm:$0xff] }
  0x3e   :  { %364 = vmatpush3.bf16.msra.mxu0 %v363_v7  ;;  %v387_v32 = vpack.c.bf16 %v193_v31, %v192_v30  ;;  %v142_v54 = vld [vmem:[%s603_s2] sm:$0x1]  ;;  %s466_s2 = scalar_lea.vmem %s279_s15, 128 }
  0x3f   :  { %370 = vmatpush3.bf16.msra.mxu1 %v369_v14  ;;  %v289_v59 = vld [vmem:[%s604_s3] ss:$0 sm:$0xff]  ;;  %p467_p10 = scmp.ne.s32.totalorder %s279_s15, %s466_s2  ;;  %p472_p12 = scmp.lt.s32.totalorder %s466_s2, %s466_s2 }
  0x40   :  { %371 = vmatprep.subr.bf16.mxu1 %v499_v0  ;;  %v290_v63 = vld [vmem:[%s606_s5] ss:$0 sm:$0xff] }
  0x41   :  { %322 = vmatmul.mubr.msk.f32.vlgmr.msra.gmra.mrb[0].mxu0 %vm68_vm1, %v63_v8  ;;  %p473_p13 = por %p472_p12, %p471_p11 }
  0x43   :  { %373 = vmatpush3.bf16.msra.mxu1 %v372_v17  ;;  %p474_p0 = pnand %p473_p13, %p467_p10 }
  0x44   :  { %374 = vmatprep.subr.bf16.mxu1 %v499_v0 }
  0x47   :  { %376 = vmatpush3.bf16.msra.mxu1 %v375_v20 }
  0x48   :  { %377 = vmatprep.subr.bf16.mxu1 %v499_v0 }
  0x4b   :  { %379 = vmatpush3.bf16.msra.mxu1 %v378_v23 }
  0x4c   :  { %380 = vmatprep.subr.bf16.mxu1 %v499_v0 }
  0x4f   :  { %382 = vmatpush3.bf16.msra.mxu1 %v381_v26 }
  0x50   :  { %383 = vmatprep.subr.bf16.mxu1 %v499_v0 }
  0x53   :  { %385 = vmatpush3.bf16.msra.mxu1 %v384_v29 }
  0x54   :  { %386 = vmatprep.subr.bf16.mxu1 %v499_v0 }
  0x57   :  { %388 = vmatpush3.bf16.msra.mxu1 %v387_v32 }
 0x114   :  { %v138_v33 = vpop.f32.mrb[0].mxu0 }
 0x115   :  { %v144_v34 = vrot.slane %v138_v33, 4  ;;  %v323_v35 = vpop.f32.mrb[1].mxu0 }
 0x117   :  { %v145_v36 = vadd.f32 %v144_v34, %v138_v33 }
 0x119   :  { %v146_v37 = vrot.slane %v145_v36, 2 }
 0x11b   :  { %v147_v38 = vadd.f32 %v146_v37, %v145_v36 }
 0x11d   :  { %v148_v39 = vrot.slane %v147_v38, 1 }
 0x11f   :  { %v149_v40 = vadd.f32 %v148_v39, %v147_v38 }
 0x121   :  { %v150_v41 = vmul.f32 0.125, %v149_v40 }
 0x123   :  { %v151_v42 = vsub.f32 %v138_v33, %v150_v41 }
 0x125   :  { %v152_v43 = vmul.f32 %v151_v42, %v151_v42 }
 0x127   :  { %v153_v44 = vrot.slane %v152_v43, 4 }
 0x129   :  { %v154_v45 = vadd.f32 %v153_v44, %v152_v43 }
 0x12b   :  { %v155_v46 = vrot.slane %v154_v45, 2 }
 0x12d   :  { %v156_v47 = vadd.f32 %v155_v46, %v154_v45 }
 0x12f   :  { %v157_v48 = vrot.slane %v156_v47, 1 }
 0x131   :  { %v158_v49 = vadd.f32 %v157_v48, %v156_v47 }
 0x133   :  { %v159_v50 = vmul.f32 0.125, %v158_v49 }
 0x135   :  { %v160_v51 = vadd.f32 1e-05, %v159_v50 }
 0x137   :  { %398 = vrsqrt.f32 %v160_v51 }
 0x141   :  { %v399_v56 = vpop.eup %398 }
 0x142   :  { %v162_v57 = vmul.f32 %v399_v56, %v142_v54 }
 0x144   :  { %v167_v58 = vrot.slane %v162_v57, %v166_v55 }
 0x146   :  { %v169_v60 = vmul.f32 %v167_v58, %v151_v42 }
 0x148   :  { %v176_v61 = vadd.f32 %v289_v59, %v169_v60 }
 0x14a   :  { %v177_v62 = vmax.f32 %v176_v61, 0.0 }
 0x14c   :  { %357 = vmatmul.mubr.f32.vlgmr.msra.gmra.mrb[0].mxu1 %v177_v62 }
 0x21f   :  { %v267_v0 = vpop.f32.mrb[0].mxu1 }
 0x220   :  { %v268_v1 = vadd.f32 %v290_v63, %v267_v0  ;;  %v358_v2 = vpop.f32.mrb[1].mxu1 }
 0x222   :  { %271 = vst [vmem:[#allocation8] sm:$0xff] %v268_v1 }
 0x223   :  { %477 = shalt.err (!%p474_p0)
}
 0x224   :  { %s478_s17 = scalar_lea.hbm %s607_s6, 128 }
 0x225   :  { %p479_p1 = scmp.ne.s32.totalorder %s607_s6, %s478_s17  ;;  %p482_p2 = scmp.lt.u32.totalorder %s478_s17, %s607_s6 }
 0x227   :  { %p484_p3 = pnand %p482_p2, %p479_p1 }
 0x229   :  { %487 = shalt.err (!%p484_p3)
}
 0x22a   :  { %281 = dma.vmem_to_hbm [thread:$0]  %s279_s15, 128, %s607_s6, [#allocation4]  }
 0x22b   :  { %492 = dma.done.wait [#allocation4], 128  }
 0x22c   :  { %493 = vsyncadd [#allocation4], 4294967168 }
 0x22d   :  { %285 = vsyncpa [#allocation3], 1 }
 0x22e   :  { %286 = vsyncpa [#allocation6], 1 }
 0x22f   :  { %287 = vsyncpa [#allocation4], 1 }

// kernel: tpu_custom_call.1
= control target key start
LH: loop header
LB: loop body
LE: loop exit
PB: predicated region body
PF: predicated region fallthrough
CT: control target
= control target key end

     0   :  { %11 = vsyncpa [#allocation3], 0  ;;  %s601_s0 = inlined_call_operand.hbm [shape: f32[8,32], index: 0, kind: input, shape index: {}]   ;;  %s602_s1 = inlined_call_operand.hbm [shape: f32[32,128], index: 1, kind: input, shape index: {}]   ;;  %s603_s2 = inlined_call_operand.vmem [shape: f32[1,128], index: 2, kind: input, shape index: {}]   ;;  %s604_s3 = inlined_call_operand.vmem [shape: f32[1,128], index: 3, kind: input, shape index: {}]   ;;  %s605_s4 = inlined_call_operand.hbm [shape: f32[128,128], index: 4, kind: input, shape index: {}]   ;;  %s606_s5 = inlined_call_operand.vmem [shape: f32[1,128], index: 5, kind: input, shape index: {}]   ;;  %s607_s6 = inlined_call_operand.hbm [shape: f32[8,128], index: 6, kind: output, shape index: {}]  }
   0x1   :  { %12 = vsyncpa [#allocation6], 0 }
   0x2   :  { %13 = vsyncpa [#allocation4], 0  ;;  %s494_s21 = smov [#allocation5]   ;;  %s400_s25 = scalar_lea.hbm %s602_s1, 512 }
   0x3   :  { %s29_s22 = sshll.u32 %s494_s21, 4  ;;  %p401_p0 = scmp.ne.s32.totalorder %s602_s1, %s400_s25  ;;  %s30_s22 = int_to_ptr.vmem [resolvable:$true] %s29_s22 }
   0x4   :  { %p404_p1 = scmp.lt.u32.totalorder %s400_s25, %s602_s1 }
   0x6   :  { %p406_p2 = pnand %p404_p1, %p401_p0 }
   0x8   :  { %409 = shalt.err (!%p406_p2)
}
   0x9   :  { %s410_s30 = scalar_lea.vmem %s30_s22, 512  ;;  %p415_p4 = scmp.lt.s32.totalorder %s30_s22, %s30_s22 }
   0xa   :  { %p411_p3 = scmp.ne.s32.totalorder %s30_s22, %s410_s30  ;;  %p416_p5 = scmp.lt.s32.totalorder %s410_s30, %s410_s30 }
   0xc   :  { %p417_p6 = por %p416_p5, %p415_p4 }
   0xe   :  { %p418_p7 = pnand %p417_p6, %p411_p3 }
  0x10   :  { %421 = shalt.err (!%p418_p7)
}
  0x11   :  { %s495_s7 = smov 128   ;;  %s496_s8 = smov 8  }
  0x12   :  { %35 = dma.hbm_to_vmem [thread:$0]  %s602_s1, 512, %s30_s22, [#allocation6], %s495_s7, %s495_s7, %s496_s8  }
  0x13   :  { %s497_s11 = smov [#allocation2]   ;;  %s498_s13 = smov [#allocation7]  }
  0x14   :  { %s20_s12 = sshll.u32 %s497_s11, 4  ;;  %s45_s14 = sshll.u32 %s498_s13, 4  ;;  %s21_s12 = int_to_ptr.vmem [resolvable:$true] %s20_s12  ;;  %s46_s14 = int_to_ptr.vmem [resolvable:$true] %s45_s14 }
  0x15   :  { %s422_s17 = scalar_lea.hbm %s601_s0, 128 }
  0x16   :  { %p423_p8 = scmp.ne.s32.totalorder %s601_s0, %s422_s17  ;;  %p426_p9 = scmp.lt.u32.totalorder %s422_s17, %s601_s0 }
  0x18   :  { %p428_p10 = pnand %p426_p9, %p423_p8 }
  0x1a   :  { %431 = shalt.err (!%p428_p10)
}
  0x1b   :  { %s432_s1 = scalar_lea.vmem %s21_s12, 128  ;;  %p437_p12 = scmp.lt.s32.totalorder %s21_s12, %s21_s12 }
  0x1c   :  { %p433_p11 = scmp.ne.s32.totalorder %s21_s12, %s432_s1  ;;  %p438_p13 = scmp.lt.s32.totalorder %s432_s1, %s432_s1 }
  0x1e   :  { %p439_p0 = por %p438_p13, %p437_p12 }
  0x20   :  { %p440_p1 = pnand %p439_p0, %p433_p11 }
  0x22   :  { %443 = shalt.err (!%p440_p1)
}
  0x23   :  { %23 = dma.hbm_to_vmem [thread:$0]  %s601_s0, 128, %s21_s12, [#allocation3]  }
  0x24   :  { %s444_s26 = scalar_lea.hbm %s605_s4, 2048 }
  0x25   :  { %p445_p2 = scmp.ne.s32.totalorder %s605_s4, %s444_s26  ;;  %p448_p3 = scmp.lt.u32.totalorder %s444_s26, %s605_s4 }
  0x27   :  { %p450_p4 = pnand %p448_p3, %p445_p2 }
  0x29   :  { %453 = shalt.err (!%p450_p4)
}
  0x2a   :  { %s454_s9 = scalar_lea.vmem %s46_s14, 2048  ;;  %p459_p6 = scmp.lt.s32.totalorder %s46_s14, %s46_s14 }
  0x2b   :  { %p455_p5 = scmp.ne.s32.totalorder %s46_s14, %s454_s9  ;;  %p460_p7 = scmp.lt.s32.totalorder %s454_s9, %s454_s9 }
  0x2d   :  { %p461_p8 = por %p460_p7, %p459_p6 }
  0x2f   :  { %p462_p9 = pnand %p461_p8, %p455_p5 }
  0x31   :  { %465 = shalt.err (!%p462_p9)
}
  0x32   :  { %51 = dma.hbm_to_vmem [thread:$0]  %s605_s4, 2048, %s46_s14, [#allocation6], %s495_s7, %s495_s7, %s496_s8  }
  0x33   :  { %488 = dma.done.wait [#allocation3], 128  }
  0x34   :  { %489 = vsyncadd [#allocation3], 4294967168 }
  0x35   :  { %490 = dma.done.wait [#allocation6], 2560  }
  0x36   :  { %491 = vsyncadd [#allocation6], 4294964736  ;;  %v499_v0 = vmov 0.0|0.0   ;;  %vm500_vm0 = vmmov 0   ;;  %v501_v1 = vmov 0.0   ;;  %v64_v2 = vld [vmem:[#allocation5] sm:$0xff]  ;;  %v164_v52 = vlaneseq }
  0x37   :  { %359 = vmatprep.subr.bf16.mxu0 %v499_v0  ;;  %321 = vmatprep.mubr.msk.f32.mxu0 %vm500_vm0, %v501_v1  ;;  %v65_v3 = vld [vmem:[#allocation5 + $0x8] sm:$0xff]  ;;  %v66_v4 = vld [vmem:[#allocation5 + $0x10] sm:$0xff]  ;;  %v67_v6 = vld [vmem:[#allocation5 + $0x18] sm:$0xff]  ;;  %vm68_vm1 = vcmask 261120   ;;  %s502_s14 = smov [#allocation8]  }
  0x38   :  { %365 = vmatprep.subr.bf16.mxu1 %v499_v0  ;;  %356 = vmatprep.mubr.msk.f32.mxu1 %vm500_vm0, %v501_v1  ;;  %v360_v5 = vpack.c.bf16 %v65_v3, %v64_v2  ;;  %v363_v7 = vpack.c.bf16 %v67_v6, %v66_v4  ;;  %v63_v8 = vld [vmem:[#allocation2] sm:$0xff]  ;;  %v178_v9 = vld [vmem:[#allocation7] sm:$0xff]  ;;  %v179_v10 = vld [vmem:[#allocation7 + $0x8] sm:$0xff]  ;;  %v165_v53 = vshrl.u32 %v164_v52, 7  ;;  %s278_s15 = sshll.u32 %s502_s14, 4  ;;  %s279_s15 = int_to_ptr.vmem [resolvable:$true] %s278_s15 }
  0x39   :  { %v366_v11 = vpack.c.bf16 %v179_v10, %v178_v9  ;;  %v180_v12 = vld [vmem:[#allocation7 + $0x10] sm:$0xff]  ;;  %v181_v13 = vld [vmem:[#allocation7 + $0x18] sm:$0xff]  ;;  %v182_v15 = vld [vmem:[#allocation7 + $0x20] sm:$0xff]  ;;  %p471_p11 = scmp.lt.s32.totalorder %s279_s15, %s279_s15 }
  0x3a   :  { %361 = vmatpush3.bf16.msra.mxu0 %v360_v5  ;;  %v369_v14 = vpack.c.bf16 %v181_v13, %v180_v12  ;;  %v183_v16 = vld [vmem:[#allocation7 + $0x28] sm:$0xff]  ;;  %v184_v18 = vld [vmem:[#allocation7 + $0x30] sm:$0xff]  ;;  %v185_v19 = vld [vmem:[#allocation7 + $0x38] sm:$0xff]  ;;  %v166_v55 = vsub.s32 0, %v165_v53 }
  0x3b   :  { %362 = vmatprep.subr.bf16.mxu0 %v499_v0  ;;  %367 = vmatpush3.bf16.msra.mxu1 %v366_v11  ;;  %v372_v17 = vpack.c.bf16 %v183_v16, %v182_v15  ;;  %v375_v20 = vpack.c.bf16 %v185_v19, %v184_v18  ;;  %v186_v21 = vld [vmem:[#allocation7 + $0x40] sm:$0xff]  ;;  %v187_v22 = vld [vmem:[#allocation7 + $0x48] sm:$0xff]  ;;  %v188_v24 = vld [vmem:[#allocation7 + $0x50] sm:$0xff] }
  0x3c   :  { %368 = vmatprep.subr.bf16.mxu1 %v499_v0  ;;  %v378_v23 = vpack.c.bf16 %v187_v22, %v186_v21  ;;  %v189_v25 = vld [vmem:[#allocation7 + $0x58] sm:$0xff]  ;;  %v190_v27 = vld [vmem:[#allocation7 + $0x60] sm:$0xff]  ;;  %v191_v28 = vld [vmem:[#allocation7 + $0x68] sm:$0xff] }
  0x3d   :  { %v381_v26 = vpack.c.bf16 %v189_v25, %v188_v24  ;;  %v384_v29 = vpack.c.bf16 %v191_v28, %v190_v27  ;;  %v192_v30 = vld [vmem:[#allocation7 + $0x70] sm:$0xff]  ;;  %v193_v31 = vld [vmem:[#allocation7 + $0x78] sm:$0xff] }
  0x3e   :  { %364 = vmatpush3.bf16.msra.mxu0 %v363_v7  ;;  %v387_v32 = vpack.c.bf16 %v193_v31, %v192_v30  ;;  %v142_v54 = vld [vmem:[%s603_s2] sm:$0x1]  ;;  %s466_s2 = scalar_lea.vmem %s279_s15, 128 }
  0x3f   :  { %370 = vmatpush3.bf16.msra.mxu1 %v369_v14  ;;  %v289_v59 = vld [vmem:[%s604_s3] ss:$0 sm:$0xff]  ;;  %p467_p10 = scmp.ne.s32.totalorder %s279_s15, %s466_s2  ;;  %p472_p12 = scmp.lt.s32.totalorder %s466_s2, %s466_s2 }
  0x40   :  { %371 = vmatprep.subr.bf16.mxu1 %v499_v0  ;;  %v290_v63 = vld [vmem:[%s606_s5] ss:$0 sm:$0xff] }
  0x41   :  { %322 = vmatmul.mubr.msk.f32.vlgmr.msra.gmra.mrb[0].mxu0 %vm68_vm1, %v63_v8  ;;  %p473_p13 = por %p472_p12, %p471_p11 }
  0x43   :  { %373 = vmatpush3.bf16.msra.mxu1 %v372_v17  ;;  %p474_p0 = pnand %p473_p13, %p467_p10 }
  0x44   :  { %374 = vmatprep.subr.bf16.mxu1 %v499_v0 }
  0x47   :  { %376 = vmatpush3.bf16.msra.mxu1 %v375_v20 }
  0x48   :  { %377 = vmatprep.subr.bf16.mxu1 %v499_v0 }
  0x4b   :  { %379 = vmatpush3.bf16.msra.mxu1 %v378_v23 }
  0x4c   :  { %380 = vmatprep.subr.bf16.mxu1 %v499_v0 }
  0x4f   :  { %382 = vmatpush3.bf16.msra.mxu1 %v381_v26 }
  0x50   :  { %383 = vmatprep.subr.bf16.mxu1 %v499_v0 }
  0x53   :  { %385 = vmatpush3.bf16.msra.mxu1 %v384_v29 }
  0x54   :  { %386 = vmatprep.subr.bf16.mxu1 %v499_v0 }
  0x57   :  { %388 = vmatpush3.bf16.msra.mxu1 %v387_v32 }
 0x114   :  { %v138_v33 = vpop.f32.mrb[0].mxu0 }
 0x115   :  { %v144_v34 = vrot.slane %v138_v33, 4  ;;  %v323_v35 = vpop.f32.mrb[1].mxu0 }
 0x117   :  { %v145_v36 = vadd.f32 %v144_v34, %v138_v33 }
 0x119   :  { %v146_v37 = vrot.slane %v145_v36, 2 }
 0x11b   :  { %v147_v38 = vadd.f32 %v146_v37, %v145_v36 }
 0x11d   :  { %v148_v39 = vrot.slane %v147_v38, 1 }
 0x11f   :  { %v149_v40 = vadd.f32 %v148_v39, %v147_v38 }
 0x121   :  { %v150_v41 = vmul.f32 0.125, %v149_v40 }
 0x123   :  { %v151_v42 = vsub.f32 %v138_v33, %v150_v41 }
 0x125   :  { %v152_v43 = vmul.f32 %v151_v42, %v151_v42 }
 0x127   :  { %v153_v44 = vrot.slane %v152_v43, 4 }
 0x129   :  { %v154_v45 = vadd.f32 %v153_v44, %v152_v43 }
 0x12b   :  { %v155_v46 = vrot.slane %v154_v45, 2 }
 0x12d   :  { %v156_v47 = vadd.f32 %v155_v46, %v154_v45 }
 0x12f   :  { %v157_v48 = vrot.slane %v156_v47, 1 }
 0x131   :  { %v158_v49 = vadd.f32 %v157_v48, %v156_v47 }
 0x133   :  { %v159_v50 = vmul.f32 0.125, %v158_v49 }
 0x135   :  { %v160_v51 = vadd.f32 1e-05, %v159_v50 }
 0x137   :  { %398 = vrsqrt.f32 %v160_v51 }
 0x141   :  { %v399_v56 = vpop.eup %398 }
 0x142   :  { %v162_v57 = vmul.f32 %v399_v56, %v142_v54 }
 0x144   :  { %v167_v58 = vrot.slane %v162_v57, %v166_v55 }
 0x146   :  { %v169_v60 = vmul.f32 %v167_v58, %v151_v42 }
 0x148   :  { %v176_v61 = vadd.f32 %v289_v59, %v169_v60 }
 0x14a   :  { %v177_v62 = vmax.f32 %v176_v61, 0.0 }
 0x14c   :  { %357 = vmatmul.mubr.f32.vlgmr.msra.gmra.mrb[0].mxu1 %v177_v62 }
 0x21f   :  { %v267_v0 = vpop.f32.mrb[0].mxu1 }
 0x220   :  { %v268_v1 = vadd.f32 %v290_v63, %v267_v0  ;;  %v358_v2 = vpop.f32.mrb[1].mxu1 }
 0x222   :  { %271 = vst [vmem:[#allocation8] sm:$0xff] %v268_v1 }
 0x223   :  { %477 = shalt.err (!%p474_p0)
}
 0x224   :  { %s478_s17 = scalar_lea.hbm %s607_s6, 128 }
 0x225   :  { %p479_p1 = scmp.ne.s32.totalorder %s607_s6, %s478_s17  ;;  %p482_p2 = scmp.lt.u32.totalorder %s478_s17, %s607_s6 }
 0x227   :  { %p484_p3 = pnand %p482_p2, %p479_p1 }
 0x229   :  { %487 = shalt.err (!%p484_p3)
}
 0x22a   :  { %281 = dma.vmem_to_hbm [thread:$0]  %s279_s15, 128, %s607_s6, [#allocation4]  }
 0x22b   :  { %492 = dma.done.wait [#allocation4], 128  }
 0x22c   :  { %493 = vsyncadd [#allocation4], 4294967168 }
 0x22d   :  { %285 = vsyncpa [#allocation3], 1 }
 0x22e   :  { %286 = vsyncpa [#allocation6], 1 }
 0x22f   :  { %287 = vsyncpa [#allocation4], 1 }

</bundles_post_ra>
